<compile_context>
chip_gen: v6e
topology: v6e:2x2x1
jax: 0.10.0
libtpu: 0.0.40
codegen_flags: <defaults>
</compile_context>

<pallas_src>
import functools

import jax
import jax.numpy as jnp
from jax.experimental import pallas as pl
from jax.experimental.pallas import tpu as pltpu


def _scalar_multiply_kernel(scale_ref, x_ref, o_ref, *, native_mul):
    # SMEM scalar read rides the scalar slot (free); multiply is a single VPU op.
    scale = scale_ref[0]
    if native_mul:
        # Native-dtype multiply (f32 always; bf16/f16 on bf16-capable VPUs).
        o_ref[...] = x_ref[...] * scale.astype(o_ref.dtype)
    else:
        # Upcast path for packed float dtypes on chips without bf16 VALU.
        o_ref[...] = (x_ref[...].astype(jnp.float32) * scale).astype(o_ref.dtype)


# Widest-first lane candidates: wide, lane-dense out_specs -> unmasked vst and
# long contiguous DMA descriptors.
_LANE_CANDIDATES = (8192, 4096, 2048, 1024, 512, 256, 128)


@functools.lru_cache(maxsize=1)
def _chip_config():
    """(block_bytes, two_tensorcores, native_bf16_vpu) for the local chip."""
    try:
        kind = jax.devices()[0].device_kind.lower()
    except Exception:  # pragma: no cover - defensive; fall back to safe defaults
        kind = ""
    is_v6 = "v6" in kind
    is_v7 = "v7" in kind
    if is_v6 or is_v7:
        # 4 MiB blocks: double-buffered in+out = 16 MiB < 32 MiB default scoped
        # VMEM on v6e/v7x; keeps per-step overhead <10% even at 3.2 TB/s HBM.
        block_bytes = 4 * 1024 * 1024
        native_bf16 = True
    else:
        # v5e (and unknown/older chips): 2 MiB blocks -> 8 MiB double-buffered,
        # safely inside the 16 MiB default scoped VMEM; at ~820 GB/s the fixed
        # per-step overhead is already <10% so bigger blocks buy nothing.
        block_bytes = 2 * 1024 * 1024
        native_bf16 = False
    return block_bytes, is_v7, native_bf16


def _run_kernel(x2d, scale, donate_x):
    """Run the Pallas kernel on a (rows, lane) slab. lane is a multiple of 128."""
    rows, lane = x2d.shape
    dt = jnp.dtype(x2d.dtype)
    itemsize = dt.itemsize
    block_bytes, two_tc, native_bf16 = _chip_config()

    native_mul = (dt == jnp.dtype(jnp.float32)) or (
        native_bf16 and dt in (jnp.dtype(jnp.bfloat16), jnp.dtype(jnp.float16))
    )

    # Sublane packing multiple: 8 (f32), 16 (bf16/f16), 32 (int8/fp8).
    sub = max(8, 32 // itemsize)

    # Rows per block: aim for ~block_bytes, aligned to sublane packing.
    target_rows = max(1, block_bytes // (lane * itemsize))
    target_rows = max(sub, (target_rows // sub) * sub)
    if target_rows >= rows:
        tile_rows = rows  # full row extent: always a legal block dim
    else:
        tile_rows = target_rows
        # Prefer a divisor of `rows` within ~25% of the byte target so the last
        # block is not ragged (no masked stores / padded reads). On 2-TC chips
        # additionally prefer an even number of grid steps for balanced sharding.
        lo = max(sub, int(target_rows * 0.75))
        hi = int(target_rows * 1.25)
        divisors = [
            c for c in range(hi - hi % sub, lo - 1, -sub)
            if c > 0 and rows % c == 0
        ]
        if two_tc:
            even = [c for c in divisors if (rows // c) % 2 == 0]
            if even:
                divisors = even
        if divisors:
            tile_rows = divisors[0]

    grid = (pl.cdiv(rows, tile_rows),)

    kernel = functools.partial(_scalar_multiply_kernel, native_mul=native_mul)

    return pl.pallas_call(
        kernel,
        out_shape=jax.ShapeDtypeStruct((rows, lane), x2d.dtype),
        grid=grid,
        in_specs=[
            # Runtime scalar in SMEM: reusable across scale values, no retrace.
            pl.BlockSpec(memory_space=pltpu.MemorySpace.SMEM),
            pl.BlockSpec((tile_rows, lane), lambda i: (i, 0)),
        ],
        out_specs=pl.BlockSpec((tile_rows, lane), lambda i: (i, 0)),
        compiler_params=pltpu.CompilerParams(
            dimension_semantics=("parallel",),
        ),
        # Pure-bandwidth op hint for XLA's scheduler.
        cost_estimate=pl.CostEstimate(
            flops=rows * lane,
            transcendentals=0,
            bytes_accessed=2 * rows * lane * itemsize,
        ),
        # Optional: donate x's buffer to the output (halves HBM footprint).
        input_output_aliases=({1: 0} if donate_x else {}),
    )(scale, x2d)


@functools.partial(jax.jit, static_argnames=("donate_x",))
def _scalar_multiply_impl(x, scale, donate_x=False):
    orig_shape = x.shape
    dtype = x.dtype
    n = x.size
    if n == 0:
        return x

    # Fast path: widest lane that evenly divides the flat length -> no padding,
    # single reshape (a layout-preserving bitcast under jit).
    lane = next((c for c in _LANE_CANDIDATES if n % c == 0), None)
    if lane is not None:
        out2d = _run_kernel(x.reshape(n // lane, lane), scale, donate_x)
        return out2d.reshape(orig_shape)

    # Rare fallback for odd element counts: kernel on the 128-aligned prefix,
    # tiny (<=127 element) tail handled in plain jnp. One pass over the data,
    # no pad/slice round-trips.
    x_flat = x.reshape(-1)
    n_main = n - (n % 128)
    tail = x_flat[n_main:] * scale[0].astype(dtype)
    if n_main == 0:
        return tail.reshape(orig_shape)
    lane = next(c for c in _LANE_CANDIDATES if n_main % c == 0)
    main2d = _run_kernel(
        x_flat[:n_main].reshape(n_main // lane, lane), scale, donate_x=False
    )
    return jnp.concatenate([main2d.reshape(-1), tail]).reshape(orig_shape)


def scalar_multiply(x, scale_factor, *, donate_x=False):
    """Compute x * scale_factor with a Pallas TPU kernel (any input shape)."""
    x = jnp.asarray(x)
    if not jnp.issubdtype(x.dtype, jnp.floating):
        # TODO(synk): PyTorch promotes int_tensor * float_scalar to float; use
        # plain XLA promotion here rather than forcing it through the kernel.
        return x * scale_factor
    scale = jnp.asarray(scale_factor, dtype=jnp.float32).reshape(1)
    return _scalar_multiply_impl(x, scale, donate_x=donate_x)


class ScalarMultiply:
    """JAX/Pallas equivalent of the PyTorch ScalarMultiply module."""

    def __init__(self, scale_factor):
        self.scale_factor = scale_factor

    def __call__(self, x):
        return scalar_multiply(x, self.scale_factor)


if __name__ == "__main__":
    key = jax.random.PRNGKey(0)
    scale_factor = 2.5
    mod = ScalarMultiply(scale_factor)

    # Small NCHW input consistent with a conv-style pipeline (no-pad fast path).
    x = jax.random.normal(key, (2, 4, 16, 16), dtype=jnp.float32)
    out = jax.block_until_ready(mod(x))
    ref = x * scale_factor
    assert out.shape == x.shape and out.dtype == x.dtype
    assert jnp.allclose(out, ref, atol=1e-6, rtol=1e-6)

    # Odd-sized input exercises the prefix/tail split path.
    x2 = jax.random.normal(jax.random.PRNGKey(1), (2, 3, 5, 7), dtype=jnp.float32)
    out2 = jax.block_until_ready(mod(x2))
    ref2 = x2 * scale_factor
    assert out2.shape == x2.shape and out2.dtype == x2.dtype
    assert jnp.allclose(out2, ref2, atol=1e-6, rtol=1e-6)

    # bf16 input exercises the native / upcast multiply branch.
    x3 = jax.random.normal(jax.random.PRNGKey(2), (4, 8, 128), dtype=jnp.bfloat16)
    out3 = jax.block_until_ready(mod(x3))
    ref3 = (x3.astype(jnp.float32) * scale_factor).astype(jnp.bfloat16)
    assert out3.shape == x3.shape and out3.dtype == x3.dtype
    assert jnp.allclose(
        out3.astype(jnp.float32), ref3.astype(jnp.float32), atol=1e-2, rtol=1e-2
    )

    # Medium input exercises a multi-step grid (divisor-snapped tile_rows).
    x4 = jax.random.normal(jax.random.PRNGKey(3), (8, 256, 1024), dtype=jnp.float32)
    out4 = jax.block_until_ready(mod(x4))
    ref4 = x4 * scale_factor
    assert out4.shape == x4.shape and out4.dtype == x4.dtype
    assert jnp.allclose(out4, ref4, atol=1e-6, rtol=1e-6)

    print("KERNEL_OK")
</pallas_src>

<mosaic_0001>
module attributes {stable_mosaic.version = 11 : i64} {
  func.func @_scalar_multiply_kernel(%arg0: i32, %arg1: memref<1xf32, #tpu.memory_space<smem>>, %arg2: memref<1x2048xf32, #tpu.memory_space<vmem>>, %arg3: memref<1x2048xf32, #tpu.memory_space<vmem>>) attributes {dimension_semantics = [#tpu.dimension_semantics<parallel>], iteration_bounds = array<i64: 1>, scalar_prefetch = 0 : i64, scratch_operands = 0 : i64, tpu.core_type = #tpu.core_type<tc>, window_params = [{transform_indices = @transform_0, window_bounds = array<i64: 1>}, {transform_indices = @transform_1, window_bounds = array<i64: 1, 2048>}, {transform_indices = @transform_2, window_bounds = array<i64: 1, 2048>}]} {
    %c0 = arith.constant 0 : index
    %0 = memref.load %arg1[%c0] : memref<1xf32, #tpu.memory_space<smem>>
    %c0_0 = arith.constant 0 : index
    %c0_1 = arith.constant 0 : index
    %1 = vector.load %arg2[%c0_0, %c0_1] : memref<1x2048xf32, #tpu.memory_space<vmem>>, vector<1x2048xf32>
    %2 = vector.broadcast %0 : f32 to vector<1x2048xf32>
    %3 = arith.mulf %1, %2 : vector<1x2048xf32>
    %c0_2 = arith.constant 0 : index
    %c0_3 = arith.constant 0 : index
    %4 = vector.load %arg3[%c0_2, %c0_3] : memref<1x2048xf32, #tpu.memory_space<vmem>>, vector<1x2048xf32>
    tpu.vector_store %arg3[%c0_2, %c0_3], %3 {strides = array<i32>} : memref<1x2048xf32, #tpu.memory_space<vmem>>, vector<1x2048xf32>,
    return
  }
  func.func @transform_0(%arg0: i32) -> i32 {
    %c0_i32 = arith.constant 0 : i32
    %c0_i32_0 = arith.constant 0 : i32
    return %c0_i32 : i32
  }
  func.func @transform_1(%arg0: i32) -> (i32, i32) {
    %c0_i32 = arith.constant 0 : i32
    %c0_i32_0 = arith.constant 0 : i32
    return %arg0, %c0_i32 : i32, i32
  }
  func.func @transform_2(%arg0: i32) -> (i32, i32) {
    %c0_i32 = arith.constant 0 : i32
    %c0_i32_0 = arith.constant 0 : i32
    return %arg0, %c0_i32 : i32, i32
  }
}

</mosaic_0001>

<bundles_post_ra>
// kernel: _scalar_multiply_impl.1
= control target key start
LH: loop header
LB: loop body
LE: loop exit
PB: predicated region body
PF: predicated region fallthrough
CT: control target
= control target key end

     0   :  { %s54_s0 = inlined_call_operand.<no memory space> [shape: f32[1], index: 0, kind: input, shape index: {}]   ;;  %s55_s1 = inlined_call_operand.vmem [shape: f32[1,2048], index: 1, kind: input, shape index: {}]   ;;  %s56_s2 = inlined_call_operand.vmem [shape: f32[1,2048], index: 2, kind: output, shape index: {}]  }
   0x1   :  { %v13_v0 = vld [vmem:[%s55_s1] sm:$0xff]  ;;  %v15_v1 = vstv %s54_s0  ;;  %v14_v2 = vld [vmem:[%s55_s1 + $0x8] sm:$0xff] }
   0x2   :  { %v16_v3 = vmul.f32 %v15_v1, %v13_v0  ;;  %v17_v4 = vmul.f32 %v15_v1, %v14_v2 }
   0x4   :  { %18 = vst [vmem:[%s56_s2] sm:$0xff] %v16_v3  ;;  %19 = vst [vmem:[%s56_s2 + $0x8] sm:$0xff] %v17_v4 }

</bundles_post_ra>
